<compile_context>
chip_gen: v6e
topology: v6e:2x2x1
jax: 0.10.0
libtpu: 0.0.40
codegen_flags: <defaults>
</compile_context>

<pallas_src>
import math

import jax
import jax.numpy as jnp
from jax.experimental import pallas as pl
from jax.experimental.pallas import tpu as pltpu


# -----------------------------------------------------------------------------
# init-time glue (plain JAX): sinusoidal pe table, matches the PyTorch buffer.
# Build it once, in the activation dtype, so forward() does no slice/convert.
# -----------------------------------------------------------------------------
def make_positional_encoding(d_model: int, max_len: int = 1000,
                             dtype=jnp.float32) -> jnp.ndarray:
    position = jnp.arange(max_len, dtype=jnp.float32)[:, None]            # (L, 1)
    div_term = jnp.exp(
        jnp.arange(0, d_model, 2, dtype=jnp.float32)
        * (-math.log(10000.0) / d_model)
    )                                                                     # (D/2,)
    pe = jnp.zeros((max_len, d_model), dtype=jnp.float32)
    pe = pe.at[:, 0::2].set(jnp.sin(position * div_term))
    pe = pe.at[:, 1::2].set(jnp.cos(position * div_term))
    return pe.astype(dtype)


# -----------------------------------------------------------------------------
# kernels
# -----------------------------------------------------------------------------
def _pos_enc_kernel_3d(x_ref, pe_ref, o_ref):
    # x_ref: (tb, ts, D), pe_ref: (ts, D) — broadcasted VPU add
    o_ref[...] = (x_ref[...] + pe_ref[...]).astype(o_ref.dtype)


def _pos_enc_kernel_2d(x_ref, pe_ref, o_ref):
    # x_ref: (B, tc), pe_ref: (1, tc) — lane-dense flattened view
    o_ref[...] = (x_ref[...] + pe_ref[...]).astype(o_ref.dtype)


# -----------------------------------------------------------------------------
# sizing helpers
# -----------------------------------------------------------------------------
def _sublane_quantum(dtype) -> int:
    # packed sublane quantum: 8 for 4-byte, 16 for 2-byte, 32 for 1-byte dtypes
    return max(8, 32 // jnp.dtype(dtype).itemsize)


def _choose_tile(n: int, quanta, max_elems: int) -> int:
    """Largest divisor of n that is a multiple of a quantum and <= max_elems.
    Quanta are tried in order (e.g. (16, 8) for bf16). Falls back to the
    smallest valid divisor, then to n itself (full-dim block is always legal)."""
    for q in quanta:
        divisors = [t for t in range(q, n + 1, q) if n % t == 0]
        fitting = [t for t in divisors if t <= max_elems]
        if fitting:
            return max(fitting)
    for q in quanta:
        divisors = [t for t in range(q, n + 1, q) if n % t == 0]
        if divisors:
            return min(divisors)
    return n


def _default_tile_bytes() -> int:
    # v7x: ~3.2 TB/s HBM makes the ~0.35 us/step overhead costlier -> 4 MiB
    # tiles (6-tile double-buffered footprint ~24 MiB, under the 32 MiB scoped
    # default). v5e/v6e: 2 MiB already amortizes the step overhead and keeps
    # the footprint well under v5e's 16 MiB default.
    try:
        kind = jax.devices()[0].device_kind.lower()
    except Exception:
        return 2 * 1024 * 1024
    if "v7" in kind:
        return 4 * 1024 * 1024
    return 2 * 1024 * 1024


# -----------------------------------------------------------------------------
# wrapper
# -----------------------------------------------------------------------------
def positional_encoding_forward(
    x: jnp.ndarray,
    pe: jnp.ndarray,
    *,
    target_tile_bytes: int | None = None,
    min_pallas_bytes: int = 256 * 1024,
    donate_x: bool = False,
) -> jnp.ndarray:
    """x: (B, S, D); pe: (max_len, D). Returns x + pe[:S] (same dtype as x)."""
    B, S, D = x.shape
    if S > pe.shape[0]:
        raise ValueError(f"sequence length {S} exceeds pe max_len {pe.shape[0]}")
    if pe.dtype != x.dtype:
        # Prefer building pe in the activation dtype at init (see
        # make_positional_encoding); this cast is a one-off fallback.
        pe = pe.astype(x.dtype)

    itemsize = jnp.dtype(x.dtype).itemsize
    total_bytes = B * S * D * itemsize

    # Tiny inputs (the module's default 2x8x32 ~ 2 KiB): launch + DMA setup
    # dwarf the add; let XLA fuse the broadcast-add with neighbors instead.
    if total_bytes < min_pallas_bytes:
        return x + pe[:S, :][None, :, :]

    if target_tile_bytes is None:
        target_tile_bytes = _default_tile_bytes()
    subl = _sublane_quantum(x.dtype)
    alias = {0: 0} if donate_x else {}

    if D % 128 == 0:
        # Already lane-dense: tile the sequence axis (dtype-aware sublane
        # quantum), then block the batch axis too if the whole sequence fits
        # one tile, so each block still approaches target_tile_bytes.
        quanta = (subl,) if subl == 8 else (subl, 8)
        max_ts = max(subl, target_tile_bytes // (D * itemsize))
        ts = _choose_tile(S, quanta, max_ts)
        tb = 1
        block_bytes = ts * D * itemsize
        if ts == S and B > 1 and 2 * block_bytes <= target_tile_bytes:
            tb = _choose_tile(B, (1,), max(1, target_tile_bytes // block_bytes))
        grid = (S // ts, B // tb)  # batch innermost -> pe block index repeats, no re-DMA
        return pl.pallas_call(
            _pos_enc_kernel_3d,
            out_shape=jax.ShapeDtypeStruct((B, S, D), x.dtype),
            grid_spec=pltpu.PrefetchScalarGridSpec(
                num_scalar_prefetch=0,
                grid=grid,
                in_specs=[
                    pl.BlockSpec((tb, ts, D), lambda s, b: (b, s, 0)),  # x tile
                    # index straight into the full (max_len, D) table — no
                    # wrapper-side slice op; only the first S rows are touched
                    pl.BlockSpec((ts, D), lambda s, b: (s, 0)),
                ],
                out_specs=pl.BlockSpec((tb, ts, D), lambda s, b: (b, s, 0)),
            ),
            compiler_params=pltpu.CompilerParams(
                # no reduction axis: both axes shardable across v7x's 2 TCs
                dimension_semantics=("parallel", "parallel"),
            ),
            input_output_aliases=alias,
        )(x, pe)

    # D not a multiple of 128 (module default d_model=32): a (.., D) out_spec
    # would issue masked vst.msk partial stores wasting most of each vreg row.
    # Flatten each batch row to (S*D,); pe flattens identically, so the add is
    # still a plain (1, tc) -> (B, tc) broadcast with lane-dense stores.
    flat = S * D
    x2 = x.reshape(B, flat)
    pe2 = pe[:S, :].reshape(1, flat)
    # A (B, tc) block occupies ceil(B/subl)*subl sublanes in VMEM — size the
    # chunk with the padded row count so the pipeline footprint is as claimed.
    padded_b = ((B + subl - 1) // subl) * subl
    max_tc = max(128, target_tile_bytes // (padded_b * itemsize))
    tc = _choose_tile(flat, (128,), max_tc)
    # Guarantee >= 2 grid steps on large inputs so both v7x TensorCores run.
    if tc == flat and flat * itemsize > 512 * 1024:
        tc2 = _choose_tile(flat, (128,), flat // 2)
        if tc2 < flat:
            tc = tc2
    grid = (flat // tc,)
    out2 = pl.pallas_call(
        _pos_enc_kernel_2d,
        out_shape=jax.ShapeDtypeStruct((B, flat), x.dtype),
        grid_spec=pltpu.PrefetchScalarGridSpec(
            num_scalar_prefetch=0,
            grid=grid,
            in_specs=[
                pl.BlockSpec((B, tc), lambda c: (0, c)),    # x chunk (full batch)
                pl.BlockSpec((1, tc), lambda c: (0, c)),    # matching pe chunk
            ],
            out_specs=pl.BlockSpec((B, tc), lambda c: (0, c)),
        ),
        compiler_params=pltpu.CompilerParams(
            dimension_semantics=("parallel",),
        ),
        input_output_aliases=alias,
    )(x2, pe2)
    return out2.reshape(B, S, D)


if __name__ == "__main__":
    MAX_LEN = 1000
    key = jax.random.PRNGKey(0)
    k1, k2, k3 = jax.random.split(key, 3)

    # Case 1: module-consistent small shapes (d_model=32), forced through the
    # flattened lane-dense Pallas path (min_pallas_bytes=0 bypasses the
    # small-input fallback so the kernel itself is exercised).
    B, S, D = 2, 8, 32
    x = jax.random.normal(k1, (B, S, D), dtype=jnp.float32)
    pe = make_positional_encoding(D, MAX_LEN)
    out = jax.block_until_ready(
        positional_encoding_forward(x, pe, min_pallas_bytes=0))
    ref = x + pe[:S, :][None, :, :]
    assert out.shape == (B, S, D)
    assert jnp.allclose(out, ref, atol=1e-6), "mismatch (flattened kernel path)"

    # Case 1b: same inputs through the default small-input plain-JAX fallback.
    out_fb = jax.block_until_ready(positional_encoding_forward(x, pe))
    assert jnp.allclose(out_fb, ref, atol=1e-6), "mismatch (fallback path)"

    # Case 2: lane-aligned d_model (3-D path, batch-blocked since S fits one tile).
    B2, S2, D2 = 2, 16, 128
    x2 = jax.random.normal(k2, (B2, S2, D2), dtype=jnp.float32)
    pe2 = make_positional_encoding(D2, MAX_LEN)
    out2 = jax.block_until_ready(
        positional_encoding_forward(x2, pe2, min_pallas_bytes=0))
    ref2 = x2 + pe2[:S2, :][None, :, :]
    assert jnp.allclose(out2, ref2, atol=1e-6), "mismatch (3D kernel path)"

    # Case 3: bf16 activations (dtype-aware sublane quantum, pe pre-cast at init).
    B3, S3, D3 = 2, 32, 128
    x3 = jax.random.normal(k3, (B3, S3, D3), dtype=jnp.bfloat16)
    pe3 = make_positional_encoding(D3, MAX_LEN, dtype=jnp.bfloat16)
    out3 = jax.block_until_ready(
        positional_encoding_forward(x3, pe3, min_pallas_bytes=0))
    ref3 = x3 + pe3[:S3, :][None, :, :]
    assert jnp.allclose(out3.astype(jnp.float32), ref3.astype(jnp.float32)), \
        "mismatch (bf16 3D kernel path)"

    print("KERNEL_OK")
</pallas_src>

<mosaic_0001>
module attributes {stable_mosaic.version = 11 : i64} {
  func.func @_pos_enc_kernel_2d(%arg0: i32, %arg1: memref<2x256xf32, #tpu.memory_space<vmem>>, %arg2: memref<1x256xf32, #tpu.memory_space<vmem>>, %arg3: memref<2x256xf32, #tpu.memory_space<vmem>>) attributes {dimension_semantics = [#tpu.dimension_semantics<parallel>], iteration_bounds = array<i64: 1>, scalar_prefetch = 0 : i64, scratch_operands = 0 : i64, tpu.core_type = #tpu.core_type<tc>, window_params = [{transform_indices = @transform_0, window_bounds = array<i64: 2, 256>}, {transform_indices = @transform_1, window_bounds = array<i64: 1, 256>}, {transform_indices = @transform_2, window_bounds = array<i64: 2, 256>}]} {
    %c0 = arith.constant 0 : index
    %c0_0 = arith.constant 0 : index
    %0 = vector.load %arg1[%c0, %c0_0] : memref<2x256xf32, #tpu.memory_space<vmem>>, vector<2x256xf32>
    %c0_1 = arith.constant 0 : index
    %c0_2 = arith.constant 0 : index
    %1 = vector.load %arg2[%c0_1, %c0_2] : memref<1x256xf32, #tpu.memory_space<vmem>>, vector<1x256xf32>
    %2 = vector.broadcast %1 : vector<1x256xf32> to vector<2x256xf32>
    %3 = arith.addf %0, %2 : vector<2x256xf32>
    %c0_3 = arith.constant 0 : index
    %c0_4 = arith.constant 0 : index
    %4 = vector.load %arg3[%c0_3, %c0_4] : memref<2x256xf32, #tpu.memory_space<vmem>>, vector<2x256xf32>
    tpu.vector_store %arg3[%c0_3, %c0_4], %3 {strides = array<i32>} : memref<2x256xf32, #tpu.memory_space<vmem>>, vector<2x256xf32>,
    return
  }
  func.func @transform_0(%arg0: i32) -> (i32, i32) {
    %c0_i32 = arith.constant 0 : i32
    %c0_i32_0 = arith.constant 0 : i32
    return %c0_i32, %arg0 : i32, i32
  }
  func.func @transform_1(%arg0: i32) -> (i32, i32) {
    %c0_i32 = arith.constant 0 : i32
    %c0_i32_0 = arith.constant 0 : i32
    return %c0_i32, %arg0 : i32, i32
  }
  func.func @transform_2(%arg0: i32) -> (i32, i32) {
    %c0_i32 = arith.constant 0 : i32
    %c0_i32_0 = arith.constant 0 : i32
    return %c0_i32, %arg0 : i32, i32
  }
}

</mosaic_0001>

<bundles_post_ra>
// kernel: tpu_custom_call.1
= control target key start
LH: loop header
LB: loop body
LE: loop exit
PB: predicated region body
PF: predicated region fallthrough
CT: control target
= control target key end

     0   :  { %7 = vsyncpa [#allocation3], 0  ;;  %s172_s0 = inlined_call_operand.hbm [shape: f32[2,256], index: 0, kind: input, shape index: {}]   ;;  %s173_s1 = inlined_call_operand.hbm [shape: f32[1,256], index: 1, kind: input, shape index: {}]   ;;  %s174_s2 = inlined_call_operand.hbm [shape: f32[2,256], index: 2, kind: output, shape index: {}]  }
   0x1   :  { %8 = vsyncpa [#allocation6], 0 }
   0x2   :  { %9 = vsyncpa [#allocation4], 0  ;;  %s144_s9 = smov [#allocation2]   ;;  %s145_s11 = smov [#allocation5]  }
   0x3   :  { %s16_s10 = sshll.u32 %s144_s9, 4  ;;  %s26_s12 = sshll.u32 %s145_s11, 4  ;;  %s17_s10 = int_to_ptr.vmem [resolvable:$true] %s16_s10  ;;  %s27_s12 = int_to_ptr.vmem [resolvable:$true] %s26_s12 }
   0x4   :  { %s86_s13 = scalar_lea.vmem %s17_s10, 64  ;;  %p91_p1 = scmp.lt.s32.totalorder %s17_s10, %s17_s10 }
   0x5   :  { %p87_p0 = scmp.ne.s32.totalorder %s17_s10, %s86_s13  ;;  %p92_p2 = scmp.lt.s32.totalorder %s86_s13, %s86_s13 }
   0x7   :  { %p93_p3 = por %p92_p2, %p91_p1 }
   0x9   :  { %p94_p4 = pnand %p93_p3, %p87_p0 }
   0xb   :  { %97 = shalt.err (!%p94_p4)
}
   0xc   :  { %19 = dma.hbm_to_vmem [thread:$0]  %s172_s0, 64, %s17_s10, [#allocation3]  }
   0xd   :  { %s106_s16 = scalar_lea.vmem %s27_s12, 32  ;;  %p111_p6 = scmp.lt.s32.totalorder %s27_s12, %s27_s12 }
   0xe   :  { %p107_p5 = scmp.ne.s32.totalorder %s27_s12, %s106_s16  ;;  %p112_p7 = scmp.lt.s32.totalorder %s106_s16, %s106_s16 }
  0x10   :  { %p113_p8 = por %p112_p7, %p111_p6 }
  0x12   :  { %p114_p9 = pnand %p113_p8, %p107_p5 }
  0x14   :  { %117 = shalt.err (!%p114_p9)
}
  0x15   :  { %29 = dma.hbm_to_vmem [thread:$0]  %s173_s1, 32, %s27_s12, [#allocation6]  }
  0x16   :  { %138 = dma.done.wait [#allocation3], 64  }
  0x17   :  { %139 = vsyncadd [#allocation3], 4294967232 }
  0x18   :  { %140 = dma.done.wait [#allocation6], 32  }
  0x19   :  { %141 = vsyncadd [#allocation6], 4294967264  ;;  %v39_v0 = vlaneseq  ;;  %v146_v1 = vmov 1983009808   ;;  %v37_v7 = vld [vmem:[#allocation5] sm:$0x3] }
  0x1a   :  { %v49_v2 = vunpack.c.l.s4 %v146_v1  ;;  %v36_v12 = vld [vmem:[#allocation2] sm:$0xf]  ;;  %s147_s0 = smov [#allocation7]  }
  0x1b   :  { %v40_v3 = vshrl.u32 %v39_v0, 7  ;;  %s64_s19 = sshll.u32 %s147_s0, 4  ;;  %s65_s19 = int_to_ptr.vmem [resolvable:$true] %s64_s19 }
  0x1c   :  { %v50_v6 = vunpack.c.0.s8 %v49_v2  ;;  %s118_s1 = scalar_lea.vmem %s65_s19, 64  ;;  %p123_p11 = scmp.lt.s32.totalorder %s65_s19, %s65_s19 }
  0x1d   :  { %v41_v4 = vsub.s32 0, %v40_v3  ;;  %v45_v5 = vsub.s32 1, %v40_v3  ;;  %p119_p10 = scmp.ne.s32.totalorder %s65_s19, %s118_s1  ;;  %p124_p12 = scmp.lt.s32.totalorder %s118_s1, %s118_s1 }
  0x1e   :  { %v53_v10 = vsub.s32 %v50_v6, %v40_v3 }
  0x1f   :  { %v42_v8 = vrot.slane %v37_v7, %v41_v4  ;;  %v46_v9 = vrot.slane %v37_v7, %v45_v5  ;;  %p125_p13 = por %p124_p12, %p123_p11 }
  0x21   :  { %v47_v11 = vcombine.low %v42_v8, %v46_v9  ;;  %p126_p0 = pnand %p125_p13, %p119_p10 }
  0x23   :  { %v54_v13 = vrot.slane %v47_v11, %v53_v10 }
  0x25   :  { %v56_v14 = vadd.f32 %v54_v13, %v36_v12 }
  0x27   :  { %57 = vst [vmem:[#allocation7] sm:$0xf] %v56_v14 }
  0x28   :  { %129 = shalt.err (!%p126_p0)
}
  0x29   :  { %67 = dma.vmem_to_hbm [thread:$0]  %s65_s19, 64, %s174_s2, [#allocation4]  }
  0x2a   :  { %142 = dma.done.wait [#allocation4], 64  }
  0x2b   :  { %143 = vsyncadd [#allocation4], 4294967232 }
  0x2c   :  { %71 = vsyncpa [#allocation3], 1 }
  0x2d   :  { %72 = vsyncpa [#allocation6], 1 }
  0x2e   :  { %73 = vsyncpa [#allocation4], 1 }

</bundles_post_ra>
